<compile_context>
chip_gen: v6e
topology: v6e:2x2x1
jax: 0.10.0
libtpu: 0.0.40
codegen_flags: <defaults>
</compile_context>

<pallas_src>
import jax
import jax.numpy as jnp
import numpy as np
from jax import lax
from jax.experimental import pallas as pl
from jax.experimental.pallas import tpu as pltpu

_LANE = 128
_SUBLANE = 8


def bsconvu_kernel(xm_ref, xh_ref, pw_ref, dw_ref, b_ref, o_ref):
    # xm_ref: (1, TH, Wp, Cin)      bf16  main rows of the zero-padded input tile
    # xh_ref: (1, 1, KH-1, Wp, Cin) bf16  bottom halo rows for this tile
    # pw_ref: (Cin, Cout)           bf16  pointwise 1x1 weight (no bias)
    # dw_ref: (KH, KW, Cout)        f32   depthwise weight
    # b_ref : (1, Cout)             f32   depthwise bias
    # o_ref : (1, TH, Wp, Cout)     bf16  output rows (width-padded; trimmed in wrapper)
    _, TH, Wp, _ = xm_ref.shape
    KH, KW, Cout = dw_ref.shape
    THp = TH + KH - 1
    R = THp * Wp

    # Assemble the (THp, Wp, Cin) window: main rows + (KH-1)-row bottom halo.
    x3 = jnp.concatenate([xm_ref[0], xh_ref[0, 0]], axis=0)          # (THp, Wp, Cin)

    # Pointwise 1x1 conv == channel matmul on the MXU (bf16 in, f32 accumulate).
    t2d = jnp.dot(x3.reshape(R, x3.shape[-1]), pw_ref[...],
                  preferred_element_type=jnp.float32)                # (R, Cout) f32

    # Depthwise KHxKW conv.  kw-outer so only ONE rolled copy is live at a time.
    # In the flattened row-major index r = h*Wp + w, rolling by -(kw) (== +R-kw) along
    # axis 0 realizes the column shift t[h, w+kw]; wrapped entries only ever land in the
    # padded columns w >= W, which the wrapper trims.  Row shifts (kh) are free
    # leading-dim slices.  Bias is folded into the first tap.
    acc = None
    for kw in range(KW):
        tk = t2d if kw == 0 else pltpu.roll(t2d, shift=R - kw, axis=0)
        t3 = tk.reshape(THp, Wp, Cout)
        for kh in range(KH):
            term = t3[kh:kh + TH] * dw_ref[kh, kw, :]
            if acc is None:
                acc = term + b_ref[0]
            else:
                acc = acc + term

    o_ref[0] = acc.astype(o_ref.dtype)


def _vmem_capacity_bytes():
    try:
        info = pltpu.get_tpu_info()
        cap = getattr(info, "vmem_capacity_bytes", None)
        if cap:
            return int(cap)
    except Exception:
        pass
    return 64 * 1024 * 1024  # conservative default (v7x per-core VMEM)


def _choose_tile_rows(H, Wp, cin, cout, kh, budget_bytes):
    """Largest row tile whose per-step VMEM footprint fits the budget."""
    cinp = _LANE * pl.cdiv(cin, _LANE)     # VMEM lane padding of the minor dim
    coutp = _LANE * pl.cdiv(cout, _LANE)

    def footprint(th):
        r = (th + kh - 1) * Wp
        return (2 * th * Wp * cinp * 2            # double-buffered bf16 main input block
                + 2 * (kh - 1) * Wp * cinp * 2    # double-buffered bf16 halo block
                + 2 * th * Wp * coutp * 2         # double-buffered bf16 output block
                + r * cinp * 2                    # concatenated bf16 input copy
                + r * coutp * 4                   # f32 pointwise intermediate
                + r * coutp * 4                   # one live rolled copy
                + th * Wp * coutp * 4)            # f32 accumulator

    th = max(1, min(H, 256))
    while th > 1 and footprint(th) > budget_bytes:
        th = max(1, th // 2)
    if footprint(th) > budget_bytes:
        # TODO(synk): extremely wide images would additionally need W tiling.
        raise NotImplementedError("BSConvU Pallas kernel: image too wide for a single "
                                  "row tile; W tiling not implemented")
    return th


def bsconvu_pallas(x_nchw, pw_w, dw_w, dw_b, kernel_size=3, stride=1, padding=1,
                   dilation=1, tile_rows=None):
    """x_nchw: (N, Cin, H, W); pw_w: (Cout, Cin, 1, 1); dw_w: (Cout, 1, KH, KW); dw_b: (Cout,)."""
    # TODO(synk): only stride=1, dilation=1, padding_mode='zeros' (the RFDN configuration)
    #             is implemented.
    assert stride == 1 and dilation == 1
    N, Cin, H, W = x_nchw.shape
    Cout = pw_w.shape[0]
    KH = KW = kernel_size
    assert 2 * padding == KH - 1, "expects 'same'-size output (e.g. k=3, padding=1)"

    Wp = _SUBLANE * pl.cdiv(W + 2 * padding, _SUBLANE)  # sublane-aligned padded width

    vmem_cap = _vmem_capacity_bytes()
    vmem_limit = max(32 * 1024 * 1024, int(vmem_cap * 0.85))

    if tile_rows is None:
        TH = _choose_tile_rows(H, Wp, Cin, Cout, KH, budget_bytes=int(vmem_cap * 0.4))
    else:
        TH = int(tile_rows)
    TH = max(1, min(TH, H))
    # Keep >= 2 grid programs when possible so both v7x TensorCores get work.
    if N * pl.cdiv(H, TH) < 2 and pl.cdiv(H, 2) >= 1:
        TH = min(TH, pl.cdiv(H, 2))
    TH = max(TH, KH - 1)                                 # halo construction needs TH >= KH-1
    nH = pl.cdiv(H, TH)
    Hpad = nH * TH

    # NCHW -> NHWC, quantize to bf16 for the MXU, zero-pad rows/cols.  Row count is
    # (nH+1)*TH so the main input is purely Blocked (no wrapper slice) and the bottom
    # halo rows exist for every tile.
    top = padding
    bottom = (nH + 1) * TH - padding - H
    x = jnp.transpose(x_nchw, (0, 2, 3, 1)).astype(jnp.bfloat16)
    xp = jnp.pad(x, ((0, 0), (top, bottom), (padding, Wp - W - padding), (0, 0)))
    # Bottom halo for tile i = padded rows [ (i+1)*TH, (i+1)*TH + KH-1 )  (tiny gather).
    x_halo = xp[:, TH:].reshape(N, nH, TH, Wp, Cin)[:, :, :KH - 1]     # (N, nH, KH-1, Wp, Cin)

    pw = jnp.transpose(pw_w[:, :, 0, 0], (1, 0)).astype(jnp.bfloat16)   # (Cin, Cout)
    dw = jnp.transpose(dw_w[:, 0, :, :], (1, 2, 0)).astype(jnp.float32)  # (KH, KW, Cout)
    b = dw_b.astype(jnp.float32).reshape(1, Cout)

    out_nhwc = pl.pallas_call(
        bsconvu_kernel,
        out_shape=jax.ShapeDtypeStruct((N, Hpad, Wp, Cout), jnp.bfloat16),
        grid_spec=pltpu.PrefetchScalarGridSpec(
            num_scalar_prefetch=0,
            grid=(N, nH),
            in_specs=[
                pl.BlockSpec((1, TH, Wp, Cin), lambda n, i: (n, i, 0, 0)),
                pl.BlockSpec((1, 1, KH - 1, Wp, Cin), lambda n, i: (n, i, 0, 0, 0)),
                pl.BlockSpec((Cin, Cout), lambda n, i: (0, 0)),
                pl.BlockSpec((KH, KW, Cout), lambda n, i: (0, 0, 0)),
                pl.BlockSpec((1, Cout), lambda n, i: (0, 0)),
            ],
            out_specs=pl.BlockSpec((1, TH, Wp, Cout), lambda n, i: (n, i, 0, 0)),
        ),
        compiler_params=pltpu.CompilerParams(
            dimension_semantics=("parallel", "parallel"),
            vmem_limit_bytes=vmem_limit),
    )(xp, x_halo, pw, dw, b)

    out = out_nhwc[:, :H, :W, :]                         # drop row / width padding (bf16)
    return jnp.transpose(out, (0, 3, 1, 2)).astype(x_nchw.dtype)


def bsconvu_reference(x_nchw, pw_w, dw_w, dw_b, padding=1):
    """Pure-JAX reference (lax.conv, NCHW).  The pointwise inputs are rounded to bf16
    exactly like the kernel's MXU path; accumulation is f32."""
    dn = ("NCHW", "OIHW", "NCHW")
    xq = x_nchw.astype(jnp.bfloat16).astype(jnp.float32)
    pwq = pw_w.astype(jnp.bfloat16).astype(jnp.float32)
    y = lax.conv_general_dilated(xq, pwq, (1, 1), "VALID", dimension_numbers=dn,
                                 precision=lax.Precision.HIGHEST)
    Cout = dw_w.shape[0]
    y = lax.conv_general_dilated(y, dw_w, (1, 1),
                                 [(padding, padding), (padding, padding)],
                                 dimension_numbers=dn,
                                 feature_group_count=Cout,
                                 precision=lax.Precision.HIGHEST)
    return y + dw_b.reshape(1, Cout, 1, 1)


if __name__ == "__main__":
    key = jax.random.PRNGKey(0)
    kx, kpw, kdw, kb = jax.random.split(key, 4)

    N, Cin, H, W = 2, 4, 16, 16
    Cout, K, pad = 8, 3, 1

    x = jax.random.normal(kx, (N, Cin, H, W), dtype=jnp.float32)
    pw_w = jax.random.normal(kpw, (Cout, Cin, 1, 1), dtype=jnp.float32) * 0.1
    dw_w = jax.random.normal(kdw, (Cout, 1, K, K), dtype=jnp.float32) * 0.1
    dw_b = jax.random.normal(kb, (Cout,), dtype=jnp.float32) * 0.1

    ref = jax.block_until_ready(bsconvu_reference(x, pw_w, dw_w, dw_b, padding=pad))

    # tile_rows=6 deliberately exercises row tiling, halo handling and H-padding (nH=3).
    out = jax.block_until_ready(
        bsconvu_pallas(x, pw_w, dw_w, dw_b, kernel_size=K, padding=pad, tile_rows=6))
    # bf16 output store -> loose-ish tolerance vs the f32 reference.
    np.testing.assert_allclose(np.asarray(out), np.asarray(ref), rtol=2e-2, atol=2e-2)

    # Default tile chooser path (single row tile per image, grid = (N, 1)).
    out2 = jax.block_until_ready(
        bsconvu_pallas(x, pw_w, dw_w, dw_b, kernel_size=K, padding=pad))
    np.testing.assert_allclose(np.asarray(out2), np.asarray(ref), rtol=2e-2, atol=2e-2)

    print("KERNEL_OK")
</pallas_src>

<mosaic_0001>
module attributes {stable_mosaic.version = 11 : i64} {
  func.func @bsconvu_kernel(%arg0: i32, %arg1: i32, %arg2: memref<1x6x24x4xbf16, #tpu.memory_space<vmem>>, %arg3: memref<1x1x2x24x4xbf16, #tpu.memory_space<vmem>>, %arg4: memref<4x8xbf16, #tpu.memory_space<vmem>>, %arg5: memref<3x3x8xf32, #tpu.memory_space<vmem>>, %arg6: memref<1x8xf32, #tpu.memory_space<vmem>>, %arg7: memref<1x6x24x8xbf16, #tpu.memory_space<vmem>>) attributes {dimension_semantics = [#tpu.dimension_semantics<parallel>, #tpu.dimension_semantics<parallel>], iteration_bounds = array<i64: 2, 3>, scalar_prefetch = 0 : i64, scratch_operands = 0 : i64, tpu.core_type = #tpu.core_type<tc>, window_params = [{transform_indices = @transform_0, window_bounds = array<i64: 1, 6, 24, 4>}, {transform_indices = @transform_1, window_bounds = array<i64: 1, 1, 2, 24, 4>}, {pipeline_mode = #tpu.pipeline_mode<synchronous>, transform_indices = @transform_2, window_bounds = array<i64: 4, 8>}, {pipeline_mode = #tpu.pipeline_mode<synchronous>, transform_indices = @transform_3, window_bounds = array<i64: 3, 3, 8>}, {pipeline_mode = #tpu.pipeline_mode<synchronous>, transform_indices = @transform_4, window_bounds = array<i64: 1, 8>}, {transform_indices = @transform_5, window_bounds = array<i64: 1, 6, 24, 8>}]} {
    %c0 = arith.constant 0 : index
    %c0_0 = arith.constant 0 : index
    %c0_1 = arith.constant 0 : index
    %c0_2 = arith.constant 0 : index
    %0 = vector.load %arg2[%c0, %c0_0, %c0_1, %c0_2] : memref<1x6x24x4xbf16, #tpu.memory_space<vmem>>, vector<1x6x24x4xbf16>
    %1 = vector.shape_cast %0 : vector<1x6x24x4xbf16> to vector<6x24x4xbf16>
    %c0_3 = arith.constant 0 : index
    %c0_4 = arith.constant 0 : index
    %c0_5 = arith.constant 0 : index
    %c0_6 = arith.constant 0 : index
    %c0_7 = arith.constant 0 : index
    %2 = vector.load %arg3[%c0_3, %c0_4, %c0_5, %c0_6, %c0_7] : memref<1x1x2x24x4xbf16, #tpu.memory_space<vmem>>, vector<1x1x2x24x4xbf16>
    %3 = vector.shape_cast %2 : vector<1x1x2x24x4xbf16> to vector<2x24x4xbf16>
    %4 = tpu.concatenate %1, %3 in 0 : vector<6x24x4xbf16>, vector<2x24x4xbf16> -> vector<8x24x4xbf16>
    %5 = vector.shape_cast %4 : vector<8x24x4xbf16> to vector<192x4xbf16>
    %c0_8 = arith.constant 0 : index
    %c0_9 = arith.constant 0 : index
    %6 = vector.load %arg4[%c0_8, %c0_9] : memref<4x8xbf16, #tpu.memory_space<vmem>>, vector<4x8xbf16>
    %cst = arith.constant dense<0.000000e+00> : vector<192x8xf32>
    %7 = tpu.matmul %5, %6, %cst {dimension_numbers = #tpu.dot_dimension_numbers<[1], [0], [0], [1], [0, 0, 1, 1], [], []>} : vector<192x4xbf16>, vector<4x8xbf16>, vector<192x8xf32> -> vector<192x8xf32>
    %8 = vector.shape_cast %7 : vector<192x8xf32> to vector<8x24x8xf32>
    %9 = vector.extract_strided_slice %8 {offsets = [0, 0, 0], sizes = [6, 24, 8], strides = [1, 1, 1]} : vector<8x24x8xf32> to vector<6x24x8xf32>
    %c0_10 = arith.constant 0 : index
    %c0_11 = arith.constant 0 : index
    %c0_12 = arith.constant 0 : index
    %10 = vector.load %arg5[%c0_10, %c0_11, %c0_12] : memref<3x3x8xf32, #tpu.memory_space<vmem>>, vector<1x1x8xf32>
    %11 = vector.shape_cast %10 : vector<1x1x8xf32> to vector<8xf32>
    %12 = vector.shape_cast %11 : vector<8xf32> to vector<1x1x8xf32>
    %13 = vector.broadcast %12 : vector<1x1x8xf32> to vector<6x24x8xf32>
    %14 = arith.mulf %9, %13 : vector<6x24x8xf32>
    %c0_13 = arith.constant 0 : index
    %c0_14 = arith.constant 0 : index
    %15 = vector.load %arg6[%c0_13, %c0_14] : memref<1x8xf32, #tpu.memory_space<vmem>>, vector<1x8xf32>
    %16 = vector.shape_cast %15 : vector<1x8xf32> to vector<8xf32>
    %17 = vector.shape_cast %16 : vector<8xf32> to vector<1x1x8xf32>
    %18 = vector.broadcast %17 : vector<1x1x8xf32> to vector<6x24x8xf32>
    %19 = arith.addf %14, %18 : vector<6x24x8xf32>
    %20 = vector.extract_strided_slice %8 {offsets = [1, 0, 0], sizes = [6, 24, 8], strides = [1, 1, 1]} : vector<8x24x8xf32> to vector<6x24x8xf32>
    %c1 = arith.constant 1 : index
    %c0_15 = arith.constant 0 : index
    %c0_16 = arith.constant 0 : index
    %21 = vector.load %arg5[%c1, %c0_15, %c0_16] : memref<3x3x8xf32, #tpu.memory_space<vmem>>, vector<1x1x8xf32>
    %22 = vector.shape_cast %21 : vector<1x1x8xf32> to vector<8xf32>
    %23 = vector.shape_cast %22 : vector<8xf32> to vector<1x1x8xf32>
    %24 = vector.broadcast %23 : vector<1x1x8xf32> to vector<6x24x8xf32>
    %25 = arith.mulf %20, %24 : vector<6x24x8xf32>
    %26 = arith.addf %19, %25 : vector<6x24x8xf32>
    %27 = vector.extract_strided_slice %8 {offsets = [2, 0, 0], sizes = [6, 24, 8], strides = [1, 1, 1]} : vector<8x24x8xf32> to vector<6x24x8xf32>
    %c2 = arith.constant 2 : index
    %c0_17 = arith.constant 0 : index
    %c0_18 = arith.constant 0 : index
    %28 = vector.load %arg5[%c2, %c0_17, %c0_18] : memref<3x3x8xf32, #tpu.memory_space<vmem>>, vector<1x1x8xf32>
    %29 = vector.shape_cast %28 : vector<1x1x8xf32> to vector<8xf32>
    %30 = vector.shape_cast %29 : vector<8xf32> to vector<1x1x8xf32>
    %31 = vector.broadcast %30 : vector<1x1x8xf32> to vector<6x24x8xf32>
    %32 = arith.mulf %27, %31 : vector<6x24x8xf32>
    %33 = arith.addf %26, %32 : vector<6x24x8xf32>
    %c191_i32 = arith.constant 191 : i32
    %34 = tpu.dynamic_rotate %7 by %c191_i32 dim 0 : vector<192x8xf32>, i32 -> vector<192x8xf32>
    %35 = vector.shape_cast %34 : vector<192x8xf32> to vector<8x24x8xf32>
    %36 = vector.extract_strided_slice %35 {offsets = [0, 0, 0], sizes = [6, 24, 8], strides = [1, 1, 1]} : vector<8x24x8xf32> to vector<6x24x8xf32>
    %c0_19 = arith.constant 0 : index
    %c1_20 = arith.constant 1 : index
    %c0_21 = arith.constant 0 : index
    %37 = vector.load %arg5[%c0_19, %c1_20, %c0_21] : memref<3x3x8xf32, #tpu.memory_space<vmem>>, vector<1x1x8xf32>
    %38 = vector.shape_cast %37 : vector<1x1x8xf32> to vector<8xf32>
    %39 = vector.shape_cast %38 : vector<8xf32> to vector<1x1x8xf32>
    %40 = vector.broadcast %39 : vector<1x1x8xf32> to vector<6x24x8xf32>
    %41 = arith.mulf %36, %40 : vector<6x24x8xf32>
    %42 = arith.addf %33, %41 : vector<6x24x8xf32>
    %43 = vector.extract_strided_slice %35 {offsets = [1, 0, 0], sizes = [6, 24, 8], strides = [1, 1, 1]} : vector<8x24x8xf32> to vector<6x24x8xf32>
    %c1_22 = arith.constant 1 : index
    %c1_23 = arith.constant 1 : index
    %c0_24 = arith.constant 0 : index
    %44 = vector.load %arg5[%c1_22, %c1_23, %c0_24] : memref<3x3x8xf32, #tpu.memory_space<vmem>>, vector<1x1x8xf32>
    %45 = vector.shape_cast %44 : vector<1x1x8xf32> to vector<8xf32>
    %46 = vector.shape_cast %45 : vector<8xf32> to vector<1x1x8xf32>
    %47 = vector.broadcast %46 : vector<1x1x8xf32> to vector<6x24x8xf32>
    %48 = arith.mulf %43, %47 : vector<6x24x8xf32>
    %49 = arith.addf %42, %48 : vector<6x24x8xf32>
    %50 = vector.extract_strided_slice %35 {offsets = [2, 0, 0], sizes = [6, 24, 8], strides = [1, 1, 1]} : vector<8x24x8xf32> to vector<6x24x8xf32>
    %c2_25 = arith.constant 2 : index
    %c1_26 = arith.constant 1 : index
    %c0_27 = arith.constant 0 : index
    %51 = vector.load %arg5[%c2_25, %c1_26, %c0_27] : memref<3x3x8xf32, #tpu.memory_space<vmem>>, vector<1x1x8xf32>
    %52 = vector.shape_cast %51 : vector<1x1x8xf32> to vector<8xf32>
    %53 = vector.shape_cast %52 : vector<8xf32> to vector<1x1x8xf32>
    %54 = vector.broadcast %53 : vector<1x1x8xf32> to vector<6x24x8xf32>
    %55 = arith.mulf %50, %54 : vector<6x24x8xf32>
    %56 = arith.addf %49, %55 : vector<6x24x8xf32>
    %c190_i32 = arith.constant 190 : i32
    %57 = tpu.dynamic_rotate %7 by %c190_i32 dim 0 : vector<192x8xf32>, i32 -> vector<192x8xf32>
    %58 = vector.shape_cast %57 : vector<192x8xf32> to vector<8x24x8xf32>
    %59 = vector.extract_strided_slice %58 {offsets = [0, 0, 0], sizes = [6, 24, 8], strides = [1, 1, 1]} : vector<8x24x8xf32> to vector<6x24x8xf32>
    %c0_28 = arith.constant 0 : index
    %c2_29 = arith.constant 2 : index
    %c0_30 = arith.constant 0 : index
    %60 = vector.load %arg5[%c0_28, %c2_29, %c0_30] : memref<3x3x8xf32, #tpu.memory_space<vmem>>, vector<1x1x8xf32>
    %61 = vector.shape_cast %60 : vector<1x1x8xf32> to vector<8xf32>
    %62 = vector.shape_cast %61 : vector<8xf32> to vector<1x1x8xf32>
    %63 = vector.broadcast %62 : vector<1x1x8xf32> to vector<6x24x8xf32>
    %64 = arith.mulf %59, %63 : vector<6x24x8xf32>
    %65 = arith.addf %56, %64 : vector<6x24x8xf32>
    %66 = vector.extract_strided_slice %58 {offsets = [1, 0, 0], sizes = [6, 24, 8], strides = [1, 1, 1]} : vector<8x24x8xf32> to vector<6x24x8xf32>
    %c1_31 = arith.constant 1 : index
    %c2_32 = arith.constant 2 : index
    %c0_33 = arith.constant 0 : index
    %67 = vector.load %arg5[%c1_31, %c2_32, %c0_33] : memref<3x3x8xf32, #tpu.memory_space<vmem>>, vector<1x1x8xf32>
    %68 = vector.shape_cast %67 : vector<1x1x8xf32> to vector<8xf32>
    %69 = vector.shape_cast %68 : vector<8xf32> to vector<1x1x8xf32>
    %70 = vector.broadcast %69 : vector<1x1x8xf32> to vector<6x24x8xf32>
    %71 = arith.mulf %66, %70 : vector<6x24x8xf32>
    %72 = arith.addf %65, %71 : vector<6x24x8xf32>
    %73 = vector.extract_strided_slice %58 {offsets = [2, 0, 0], sizes = [6, 24, 8], strides = [1, 1, 1]} : vector<8x24x8xf32> to vector<6x24x8xf32>
    %c2_34 = arith.constant 2 : index
    %c2_35 = arith.constant 2 : index
    %c0_36 = arith.constant 0 : index
    %74 = vector.load %arg5[%c2_34, %c2_35, %c0_36] : memref<3x3x8xf32, #tpu.memory_space<vmem>>, vector<1x1x8xf32>
    %75 = vector.shape_cast %74 : vector<1x1x8xf32> to vector<8xf32>
    %76 = vector.shape_cast %75 : vector<8xf32> to vector<1x1x8xf32>
    %77 = vector.broadcast %76 : vector<1x1x8xf32> to vector<6x24x8xf32>
    %78 = arith.mulf %73, %77 : vector<6x24x8xf32>
    %79 = arith.addf %72, %78 : vector<6x24x8xf32>
    %80 = arith.truncf %79 : vector<6x24x8xf32> to vector<6x24x8xbf16>
    %c0_37 = arith.constant 0 : index
    %c0_38 = arith.constant 0 : index
    %c0_39 = arith.constant 0 : index
    %c0_40 = arith.constant 0 : index
    %81 = vector.load %arg7[%c0_37, %c0_38, %c0_39, %c0_40] : memref<1x6x24x8xbf16, #tpu.memory_space<vmem>>, vector<1x6x24x8xbf16>
    %82 = vector.shape_cast %81 : vector<1x6x24x8xbf16> to vector<6x24x8xbf16>
    %83 = vector.shape_cast %80 : vector<6x24x8xbf16> to vector<1x6x24x8xbf16>
    tpu.vector_store %arg7[%c0_37, %c0_38, %c0_39, %c0_40], %83 {strides = array<i32>} : memref<1x6x24x8xbf16, #tpu.memory_space<vmem>>, vector<1x6x24x8xbf16>,
    return
  }
  func.func @transform_0(%arg0: i32, %arg1: i32) -> (i32, i32, i32, i32) {
    %c0_i32 = arith.constant 0 : i32
    %c0_i32_0 = arith.constant 0 : i32
    %c0_i32_1 = arith.constant 0 : i32
    return %arg0, %arg1, %c0_i32, %c0_i32_0 : i32, i32, i32, i32
  }
  func.func @transform_1(%arg0: i32, %arg1: i32) -> (i32, i32, i32, i32, i32) {
    %c0_i32 = arith.constant 0 : i32
    %c0_i32_0 = arith.constant 0 : i32
    %c0_i32_1 = arith.constant 0 : i32
    %c0_i32_2 = arith.constant 0 : i32
    return %arg0, %arg1, %c0_i32, %c0_i32_0, %c0_i32_1 : i32, i32, i32, i32, i32
  }
  func.func @transform_2(%arg0: i32, %arg1: i32) -> (i32, i32) {
    %c0_i32 = arith.constant 0 : i32
    %c0_i32_0 = arith.constant 0 : i32
    %c0_i32_1 = arith.constant 0 : i32
    return %c0_i32, %c0_i32_0 : i32, i32
  }
  func.func @transform_3(%arg0: i32, %arg1: i32) -> (i32, i32, i32) {
    %c0_i32 = arith.constant 0 : i32
    %c0_i32_0 = arith.constant 0 : i32
    %c0_i32_1 = arith.constant 0 : i32
    %c0_i32_2 = arith.constant 0 : i32
    return %c0_i32, %c0_i32_0, %c0_i32_1 : i32, i32, i32
  }
  func.func @transform_4(%arg0: i32, %arg1: i32) -> (i32, i32) {
    %c0_i32 = arith.constant 0 : i32
    %c0_i32_0 = arith.constant 0 : i32
    %c0_i32_1 = arith.constant 0 : i32
    return %c0_i32, %c0_i32_0 : i32, i32
  }
  func.func @transform_5(%arg0: i32, %arg1: i32) -> (i32, i32, i32, i32) {
    %c0_i32 = arith.constant 0 : i32
    %c0_i32_0 = arith.constant 0 : i32
    %c0_i32_1 = arith.constant 0 : i32
    return %arg0, %arg1, %c0_i32, %c0_i32_0 : i32, i32, i32, i32
  }
}

</mosaic_0001>

<bundles_post_ra>
// kernel: tpu_custom_call.1
= control target key start
LH: loop header
LB: loop body
LE: loop exit
PB: predicated region body
PF: predicated region fallthrough
CT: control target
= control target key end

     0   :  { %s1511_s18 = smov 0   ;;  %s1513_s19 = smov 0   ;;  %s2495_s0 = inlined_call_operand.vmem [shape: bf16[2,24,24,4], index: 0, kind: input, shape index: {}]   ;;  %s2496_s1 = inlined_call_operand.vmem [shape: bf16[2,3,2,24,4], index: 1, kind: input, shape index: {}]   ;;  %s2497_s2 = inlined_call_operand.vmem [shape: bf16[4,8], index: 2, kind: input, shape index: {}]   ;;  %s2498_s3 = inlined_call_operand.vmem [shape: f32[3,3,8], index: 3, kind: input, shape index: {}]   ;;  %s2499_s4 = inlined_call_operand.vmem [shape: f32[1,8], index: 4, kind: input, shape index: {}]   ;;  %s2500_s5 = inlined_call_operand.vmem [shape: bf16[2,18,24,8], index: 5, kind: output, shape index: {}]  }
   0x1   :  { %s1515_s20 = smov 0   ;;  %s1517_s21 = smov 0  }
   0x2   :  { %s1519_s22 = smov 0  }
   0x3 LB: > { %s24_s23 = sadd.s32 1, %s1471_s20  ;;  %s27_s24 = sadd.s32 1, %s1475_s21  ;;  %s1479_s22 = sphi %s1519_s22, %s15_s22   ;;  %s1475_s21 = sphi %s1517_s21, %s2658_s21   ;;  %s1471_s20 = sphi %s1515_s20, %s2657_s20   ;;  %s1467_s19 = sphi %s1513_s19, %s2656_s19   ;;  %s1463_s18 = sphi %s1511_s18, %s2655_s18  }
   0x4   : > { %p25_p0 = scmp.ge.s32.totalorder %s24_s23, 3  ;;  %p1258_p1 = scmp.ge.s32.totalorder %s1479_s22, 1 }
   0x5   : > { %p225_p2 = scmp.lt.s32.totalorder %s1479_s22, 7 }
   0x6   : > { %s2660_s23 = smov (%p25_p0, %s24_s23), 0  ;;  %s2662_s24 = smov (!%p25_p0, %s27_s24), %s1475_s21 }
   0x7   : > { %p226_p3 = pnand %p1258_p1, %p225_p2  ;;  %p29_p4 = scmp.ge.s32.totalorder %s2662_s24, 2 }
   0x9   : > { %s2664_s24 = smov (%p29_p4, %s2662_s24), 0  ;;  %229 = sbr.rel (%p226_p3) target bundleno = 341 (0x155), region = 40 }
   0xe   : > { %v328_v0 = vld [vmem:[%s2497_s2] sm:$0x3]  ;;  %vm426_vm0 = vcmask 1041408   ;;  %s272_s27 = smul.u32 6, %s1463_s18  ;;  %p273_p5 = scmp.lt.s32.totalorder %s1467_s19, 1  ;;  %vm389_vm1 = vcmask 31744   ;;  %v715_v14 = vlaneseq }
   0xf   : > { %1381 = vmatprep.subr.msk.bf16.mxu0 %vm426_vm0, %v328_v0  ;;  %1382 = vmatprep.subr.msk.bf16.mxu1 %vm426_vm0, %v328_v0  ;;  %v428_v1 = vsel %vm426_vm0, %v328_v0, 0  ;;  %p285_p8 = scmp.lt.s32.totalorder %s1463_s18, 2  ;;  %v1579_v16 = vld [vmem:[%s2498_s3] ss:$0 sm:$0xff]  ;;  %v1584_v17 = vld [vmem:[%s2498_s3 + $0x4] ss:$0 sm:$0xff] }
  0x10   : > { %1354 = vmatpush3.bf16.msra.mxu0 %v428_v1  ;;  %1380 = vmatpush3.bf16.msra.mxu1 %v428_v1  ;;  %s2666_s19 = smov (!%p273_p5, %s1467_s19), 1  ;;  %p275_p6 = scmp.lt.s32.totalorder %s272_s27, 23  ;;  %v1574_v15 = vshrl.u32 %v715_v14, 7  ;;  %v1591_v19 = vld [vmem:[%s2499_s4] ss:$0 sm:$0xff]  ;;  %vm1115_vm4 = vcmask 60416  }
  0x11   : > { %p295_p7 = scmp.lt.s32.totalorder %s272_s27, 17  ;;  %s1384_s28 = smul.u32 72, %s2666_s19  ;;  %v1596_v20 = vld [vmem:[%s2498_s3 + $0x8] ss:$0 sm:$0xff]  ;;  %v1660_v50 = vld [vmem:[%s2498_s3 + $0x1] ss:$0 sm:$0xff] }
  0x12   : > { %s276_s29 = scalar_select %p275_p6, %s272_s27, 23  ;;  %vm717_vm2 = vcmp.lt.s32.totalorder %v1574_v15, 7  ;;  %vm889_vm3 = vcmp.lt.s32.totalorder %v1574_v15, 6  ;;  %v1674_v54 = vld [vmem:[%s2498_s3 + $0x2] ss:$0 sm:$0xff] }
  0x13   : > { %s2668_s27 = smov (!%p295_p7, %s272_s27), 17  ;;  %s1388_s8 = smul.u32 54, %s2666_s19  ;;  %v1686_v58 = vld [vmem:[%s2498_s3 + $0x5] ss:$0 sm:$0xff]  ;;  %v1698_v61 = vld [vmem:[%s2498_s3 + $0x9] ss:$0 sm:$0xff] }
  0x14   : > { %s1383_s30 = smul.u32 3, %s276_s29  ;;  %s2670_s18 = smov (!%p285_p8, %s1463_s18), 2 }
  0x15   : > { %s1387_s6 = smul.u32 3, %s2668_s27 }
  0x16   : > { %s279_s7 = sadd.s32 %s1384_s28, %s1383_s30  ;;  %s1386_s14 = smul.u32 18, %s2666_s19 }
  0x17   : > { %s1259_s9 = sshll.u32 %s279_s7, 2  ;;  %s1555_s13 = sadd.s32 %s1388_s8, %s1387_s6 }
  0x18   : > { %s281_s12 = scalar_lea.vmem %s2495_s0, %s1259_s9  ;;  %s1385_s15 = smul.u32 6, %s2670_s18 }
  0x19   : > { %v1429_v2 = vld [vmem:[%s281_s12] sm:$0xff]   ;;  %v1430_v3 = vld [vmem:[%s281_s12 + $0x30] sm:$0xff]   ;;  %v1431_v4 = vld [vmem:[%s281_s12 + $0x8] sm:$0xff]   ;;  %s1261_s27 = sshll.u32 %s1555_s13, 2 }
  0x1a   : > { %1355 = vmatprep.mubr.msk.bf16.mxu0 %vm389_vm1, %v1429_v2  ;;  %1367 = vmatprep.mubr.msk.bf16.mxu1 %vm389_vm1, %v1430_v3  ;;  %v1432_v5 = vld [vmem:[%s281_s12 + $0x38] sm:$0xff]   ;;  %v1433_v6 = vld [vmem:[%s281_s12 + $0x10] sm:$0xff]   ;;  %v1434_v7 = vld [vmem:[%s281_s12 + $0x40] sm:$0xff]   ;;  %s289_s16 = sadd.s32 %s1386_s14, %s1385_s15  ;;  %s2035_s29 = scalar_lea.vmem %s2500_s5, %s1261_s27 }
  0x1b   : > { %1356 = vmatmul.mubr.msk.bf16.vlgmr.msra.gmra.mxu0 %vm389_vm1, %v1431_v4  ;;  %1368 = vmatmul.mubr.msk.bf16.vlgmr.msra.gmra.mxu1 %vm389_vm1, %v1432_v5  ;;  %v1435_v8 = vld [vmem:[%s281_s12 + $0x18] sm:$0xff]   ;;  %s1260_s17 = sshll.u32 %s289_s16, 2  ;;  %v1437_v9 = vld [vmem:[%s281_s12 + $0x20] sm:$0xff]   ;;  %v1439_v12 = vld [vmem:[%s281_s12 + $0x28] sm:$0xff]  }
  0x1c   : > { %1359 = vmatprep.mubr.msk.bf16.mxu0 %vm389_vm1, %v1433_v6  ;;  %1371 = vmatprep.mubr.msk.bf16.mxu1 %vm389_vm1, %v1434_v7  ;;  %s291_s26 = scalar_lea.vmem %s2496_s1, %s1260_s17  ;;  %v1713_v2 = vld [vmem:[%s2498_s3 + $0x6] ss:$0 sm:$0xff]  ;;  %v1718_v3 = vld [vmem:[%s2498_s3 + $0xa] ss:$0 sm:$0xff] }
  0x1d   : > { %v1436_v10 = vld [vmem:[%s291_s26] sm:$0xff]   ;;  %v1438_v11 = vld [vmem:[%s291_s26 + $0x8] sm:$0xff]   ;;  %v1440_v13 = vld [vmem:[%s291_s26 + $0x10] sm:$0xff]  }
  0x23   : > { %1360 = vmatmul.mubr.msk.bf16.gmra.mxu0 %vm389_vm1, %v1435_v8  ;;  %1372 = vmatmul.mubr.msk.bf16.gmra.mxu1 %vm389_vm1, %v1436_v10 }
  0x24   : > { %1363 = vmatprep.mubr.msk.bf16.mxu0 %vm389_vm1, %v1437_v9  ;;  %1375 = vmatprep.mubr.msk.bf16.mxu1 %vm389_vm1, %v1438_v11 }
  0x2b   : > { %1364 = vmatmul.mubr.msk.bf16.gmra.mxu0 %vm389_vm1, %v1439_v12  ;;  %1376 = vmatmul.mubr.msk.bf16.gmra.mxu1 %vm389_vm1, %v1440_v13 }
  0xdb   : > { %v1586_v18 = vpop.f32.mrf.mxu0  ;;  %v1600_v22 = vpop.f32.mrf.mxu1 }
  0xdc   : > { %v566_v21 = vmul.f32 %v1586_v18, %v1579_v16  ;;  %v693_v23 = vrot.slane %v1586_v18, 1  ;;  %v867_v24 = vrot.slane %v1586_v18, 2  ;;  %v578_v25 = vmul.f32 %v1600_v22, %v1579_v16 }
  0xdd   : > { %v1610_v26 = vmul.f32 %v1600_v22, %v1584_v17  ;;  %v1612_v27 = vpop.f32.mrf.mxu0  ;;  %v1619_v29 = vmul.f32 %v1600_v22, %v1596_v20  ;;  %v705_v30 = vrot.slane %v1600_v22, 1  ;;  %v1624_v32 = vpop.f32.mrf.mxu1  ;;  %v879_v34 = vrot.slane %v1600_v22, 2 }
  0xde   : > { %2530 = vst [vmem:[#allocation2_spill] sm:$0xff] %v1612_v27  ;;  %v1615_v28 = vadd.f32 %v1591_v19, %v566_v21  ;;  %v564_v31 = vmul.f32 %v1579_v16, %v1612_v27  ;;  %v1627_v33 = vadd.f32 %v1591_v19, %v578_v25  ;;  %v2503_v35 = vrot.slane %v1612_v27, 1 }
  0xdf   : > { %v576_v36 = vmul.f32 %v1579_v16, %v1624_v32  ;;  %v1633_v37 = vpop.f32.mrf.mxu0  ;;  %v2502_v39 = vrot.slane %v1612_v27, 2  ;;  %v1639_v40 = vmul.f32 %v1584_v17, %v1624_v32  ;;  %v1643_v41 = vmul.f32 %v1596_v20, %v1624_v32  ;;  %v1645_v42 = vpop.f32.mrf.mxu1 }
  0xe0   : > { %v589_v38 = vadd.f32 %v1591_v19, %v564_v31  ;;  %2533 = vst [vmem:[#allocation5_spill] sm:$0xff] %v1645_v42  ;;  %v2505_v43 = vrot.slane %v1624_v32, 1  ;;  %v567_v44 = vmul.f32 %v1633_v37, %v1579_v16  ;;  %v613_v45 = vmul.f32 %v1633_v37, %v1584_v17 }
  0xe1   : > { %2531 = vst [vmem:[#allocation3_spill] sm:$0xff] %v1639_v40  ;;  %2532 = vst [vmem:[#allocation4_spill] sm:$0xff] %v1643_v41  ;;  %v2508_v46 = vrot.slane %v1633_v37, 1  ;;  %v467_v47 = vpop.f32.mrf.mxu0  ;;  %v1654_v48 = vadd.f32 %v1591_v19, %v576_v36  ;;  %v2504_v49 = vrot.slane %v1624_v32, 2  ;;  %v2507_v51 = vrot.slane %v1633_v37, 2  ;;  %v515_v10 = vpop.f32.mrf.mxu1 }
  0xe2   : > { %v1665_v52 = vmul.f32 %v1645_v42, %v1579_v16  ;;  %v625_v55 = vmul.f32 %v1645_v42, %v1584_v17  ;;  %v1680_v56 = vmul.f32 %v1645_v42, %v1596_v20  ;;  %v2501_v57 = vrot.slane %v1645_v42, 1 }
  0xe3   : > { %v738_v53 = vsel %vm717_vm2, %v693_v23, %v2508_v46  ;;  %v1689_v59 = vadd.f32 %v1591_v19, %v567_v44  ;;  %v910_v60 = vsel %vm889_vm3, %v867_v24, %v2507_v51  ;;  %v2506_v62 = vrot.slane %v1645_v42, 2  ;;  %v1763_v31 = vpop.f32.mrf.mxu0 }
  0xe4   : > { %2534 = vst [vmem:[#allocation6_spill] sm:$0xff] %v1665_v52  ;;  %2535 = vst [vmem:[#allocation7_spill] sm:$0xff] %v1680_v56  ;;  %v565_v63 = vmul.f32 %v1579_v16, %v467_v47  ;;  %v631_v0 = vadd.f32 %v613_v45, %v589_v38  ;;  %v1708_v1 = vsel %vm717_vm2, %v705_v30, %v2501_v57  ;;  %v692_v4 = vrot.slane %v467_v47, 1 }
  0xe5   : > { %2536 = vst [vmem:[#allocation8_spill] sm:$0xff] %v1689_v59  ;;  %v866_v5 = vrot.slane %v467_v47, 2  ;;  %v1721_v6 = vmul.f32 %v1660_v50, %v738_v53  ;;  %v1724_v7 = vmul.f32 %v1674_v54, %v910_v60  ;;  %v1728_v8 = vmul.f32 %v1686_v58, %v1708_v1 }
  0xe6   : > { %v1736_v9 = vsel %vm889_vm3, %v879_v34, %v2506_v62  ;;  %v1740_v11 = vmul.f32 %v1698_v61, %v1708_v1  ;;  %v590_v12 = vadd.f32 %v1591_v19, %v565_v63  ;;  %v739_v13 = vsel %vm717_vm2, %v692_v4, %v693_v23 }
  0xe7   : > { %2537 = vst [vmem:[#allocation9_spill] sm:$0xff] %v1724_v7  ;;  %2538 = vst [vmem:[#allocation10_spill] sm:$0xff] %v1736_v9  ;;  %v740_v14 = vsel %vm717_vm2, %v2503_v35, %v692_v4  ;;  %v1751_v18 = vmul.f32 %v1713_v2, %v1736_v9  ;;  %v1755_v21 = vmul.f32 %v1718_v3, %v1736_v9  ;;  %v704_v53 = vrot.slane %v515_v10, 1 }
  0xe8   : > { %2539 = vst [vmem:[#allocation11_spill] sm:$0xff] %v1740_v11  ;;  %v911_v25 = vsel %vm889_vm3, %v866_v5, %v867_v24  ;;  %v912_v23 = vsel %vm889_vm3, %v2502_v39, %v866_v5  ;;  %v747_v36 = vmul.f32 %v1660_v50, %v740_v14  ;;  %v1767_v38 = vmul.f32 %v1660_v50, %v739_v13 }
  0xe9   : > { %2540 = vst [vmem:[#allocation12_spill] sm:$0xff] %v1751_v18  ;;  %2541 = vst [vmem:[#allocation13_spill] sm:$0xff] %v1755_v21  ;;  %v1770_v44 = vmul.f32 %v1674_v54, %v912_v23  ;;  %v577_v45 = vmul.f32 %v1579_v16, %v515_v10  ;;  %v1774_v47 = vmul.f32 %v1674_v54, %v911_v25  ;;  %v878_v60 = vrot.slane %v515_v10, 2 }
  0xea   : > { %v1777_v24 = vmul.f32 %v1584_v17, %v515_v10  ;;  %v1783_v4 = vmul.f32 %v1596_v20, %v515_v10  ;;  %v1787_v5 = vmul.f32 %v1763_v31, %v1579_v16  ;;  %v655_v13 = vmul.f32 %v1763_v31, %v1596_v20 }
  0xeb   : > { %v1780_v63 = vadd.f32 %v1591_v19, %v577_v45  ;;  %v1795_v14 = vsel %vm717_vm2, %v704_v53, %v705_v30  ;;  %v728_v25 = vsel %vm717_vm2, %v2505_v43, %v704_v53  ;;  %v899_v10 = vsel %vm889_vm3, %v878_v60, %v879_v34  ;;  %v1809_v45 = vpop.f32.mrf.mxu1 }
  0xec   : > { %2542 = vst [vmem:[#allocation14_spill] sm:$0xff] %v1787_v5  ;;  %v900_v23 = vsel %vm889_vm3, %v2504_v49, %v878_v60  ;;  %v1812_v30 = vmul.f32 %v1686_v58, %v728_v25  ;;  %v1816_v57 = vmul.f32 %v1686_v58, %v1795_v14  ;;  %v1820_v22 = vmul.f32 %v1763_v31, %v1584_v17  ;;  %v1836_v49 = vpop.f32.mrf.mxu0 }
  0xed   : > { %v1824_v53 = vmul.f32 %v1698_v61, %v728_v25  ;;  %v1828_v60 = vmul.f32 %v1698_v61, %v1795_v14  ;;  %v1831_v39 = vmul.f32 %v1674_v54, %v900_v23  ;;  %v1834_v35 = vmul.f32 %v1674_v54, %v899_v10  ;;  %v1854_v52 = vpop.f32.mrf.mxu1 }
  0xee   : > { %2543 = vst [vmem:[#allocation15_spill] sm:$0xff] %v1812_v30  ;;  %2544 = vst [vmem:[#allocation16_spill] sm:$0xff] %v1820_v22  ;;  %v1839_v43 = vmul.f32 %v1713_v2, %v900_v23  ;;  %v1842_v34 = vmul.f32 %v1713_v2, %v899_v10  ;;  %v1845_v62 = vmul.f32 %v1718_v3, %v900_v23 }
  0xef   : > { %2545 = vst [vmem:[#allocation17_spill] sm:$0xff] %v1824_v53  ;;  %2546 = vst [vmem:[#allocation18_spill] sm:$0xff] %v1831_v39  ;;  %v673_v51 = vadd.f32 %v655_v13, %v631_v0  ;;  %v1848_v46 = vmul.f32 %v1718_v3, %v899_v10  ;;  %v643_v9 = vadd.f32 %v625_v55, %v1654_v48  ;;  %v2511_v55 = vrot.slane %v1836_v49, 1  ;;  %v1908_v56 = vpop.f32.mrf.mxu1 }
  0xf0   : > { %2547 = vst [vmem:[#allocation19_spill] sm:$0xff] %v1839_v43  ;;  %2548 = vst [vmem:[#allocation20_spill] sm:$0xff] %v1842_v34  ;;  %v667_v21 = vmul.f32 %v1809_v45, %v1596_v20  ;;  %v1858_v43 = vmul.f32 %v1809_v45, %v1584_v17  ;;  %v759_v0 = vmul.f32 %v1660_v50, %v728_v25  ;;  %v2510_v39 = vrot.slane %v1836_v49, 2  ;;  %v1874_v25 = vpop.f32.mrf.mxu0 }
  0xf1   : > { %2549 = vst [vmem:[#allocation21_spill] sm:$0xff] %v1845_v62  ;;  %2550 = vst [vmem:[#allocation22_spill] sm:$0xff] %v1848_v46  ;;  %v568_v13 = vmul.f32 %v1579_v16, %v1836_v49  ;;  %v614_v48 = vmul.f32 %v1584_v17, %v1836_v49  ;;  %v765_v62 = vadd.f32 %v747_v36, %v673_v51  ;;  %v2554_v51 = vrot.slane %v1633_v37, 2 }
  0xf2   : > { %2551 = vst [vmem:[#allocation23_spill] sm:$0xff] %v1854_v52  ;;  %2552 = vst [vmem:[#allocation24_spill] sm:$0xff] %v1858_v43  ;;  %v685_v10 = vadd.f32 %v667_v21, %v643_v9  ;;  %v1872_v23 = vmul.f32 %v1579_v16, %v1854_v52  ;;  %v2553_v9 = vrot.slane %v1633_v37, 1  ;;  %v1892_v7 = vmul.f32 %v1596_v20, %v1854_v52 }
  0xf3   : > { %v593_v43 = vadd.f32 %v1591_v19, %v568_v13  ;;  %v909_v36 = vsel %vm889_vm3, %v2554_v51, %v2510_v39  ;;  %v626_v13 = vmul.f32 %v1584_v17, %v1854_v52  ;;  %v632_v11 = vadd.f32 %v614_v48, %v590_v12 }
  0xf4   : > { %v737_v21 = vsel %vm717_vm2, %v2553_v9, %v2511_v55  ;;  %v1894_v53 = vadd.f32 %v759_v0, %v685_v10  ;;  %v1901_v37 = vmul.f32 %v1674_v54, %v909_v36  ;;  %v571_v39 = vmul.f32 %v1874_v25, %v1579_v16 }
  0xf5   : > { %v1897_v30 = vmul.f32 %v1660_v50, %v737_v21  ;;  %v788_v9 = vmul.f32 %v1686_v58, %v737_v21  ;;  %v617_v55 = vmul.f32 %v1874_v25, %v1584_v17  ;;  %v960_v12 = vmul.f32 %v1713_v2, %v909_v36 }
  0xf6   : > { %2555 = vst [vmem:[#allocation25_spill] sm:$0xff] %v1894_v53  ;;  %2557 = vst [vmem:[#allocation27_spill] sm:$0xff] %v1901_v37  ;;  %v656_v0 = vmul.f32 %v1874_v25, %v1596_v20  ;;  %v2512_v10 = vrot.slane %v1874_v25, 1  ;;  %v2514_v48 = vrot.slane %v1874_v25, 2  ;;  %v2558_v53 = vrot.slane %v1854_v52, 2 }
  0xf7   : > { %2556 = vst [vmem:[#allocation26_spill] sm:$0xff] %v1897_v30  ;;  %v806_v21 = vadd.f32 %v788_v9, %v765_v62  ;;  %v2559_v37 = vrot.slane %v1645_v42, 2  ;;  %v1925_v36 = vadd.f32 %v1591_v19, %v571_v39  ;;  %v1927_v41 = vadd.f32 %v617_v55, %v593_v43 }
  0xf8   : > { %v674_v40 = vadd.f32 %v656_v0, %v632_v11  ;;  %v2561_v62 = vrot.slane %v1763_v31, 1  ;;  %v1939_v51 = vmul.f32 %v1908_v56, %v1584_v17  ;;  %v2563_v39 = vrot.slane %v1763_v31, 2 }
  0xf9   : > { %v1922_v30 = vsel %vm889_vm3, %v2559_v37, %v2558_v53  ;;  %v644_v11 = vadd.f32 %v626_v13, %v1780_v63  ;;  %v668_v55 = vmul.f32 %v1908_v56, %v1596_v20  ;;  %v483_v37 = vpop.f32.mrf.mxu0  ;;  %v2518_v13 = vrot.slane %v1908_v56, 1 }
  0xfa   : > { %2560 = vst [vmem:[#allocation28_spill] sm:$0xff] %v1922_v30  ;;  %v1935_v9 = vsel %vm717_vm2, %v2561_v62, %v2512_v10  ;;  %v906_v43 = vsel %vm889_vm3, %v2563_v39, %v2514_v48  ;;  %v1954_v0 = vmul.f32 %v1713_v2, %v1922_v30  ;;  %v1958_v62 = vmul.f32 %v1718_v3, %v1922_v30 }
  0xfb   : > { %2562 = vst [vmem:[#allocation29_spill] sm:$0xff] %v1935_v9  ;;  %v829_v53 = vmul.f32 %v1698_v61, %v1935_v9  ;;  %v766_v10 = vadd.f32 %v1767_v38, %v674_v40  ;;  %v1962_v42 = vmul.f32 %v1674_v54, %v906_v43  ;;  %v686_v63 = vadd.f32 %v668_v55, %v644_v11 }
  0xfc   : > { %2564 = vst [vmem:[#allocation30_spill] sm:$0xff] %v1954_v0  ;;  %2565 = vst [vmem:[#allocation31_spill] sm:$0xff] %v1958_v62  ;;  %v760_v48 = vmul.f32 %v1660_v50, %v1795_v14  ;;  %v569_v9 = vmul.f32 %v1579_v16, %v483_v37  ;;  %v615_v62 = vmul.f32 %v1584_v17, %v483_v37  ;;  %v696_v30 = vrot.slane %v483_v37, 1 }
  0xfd   : > { %2566 = vst [vmem:[#allocation32_spill] sm:$0xff] %v1962_v42  ;;  %v847_v39 = vadd.f32 %v829_v53, %v806_v21  ;;  %v1972_v38 = vmul.f32 %v1713_v2, %v906_v43  ;;  %v2568_v21 = vrot.slane %v1809_v45, 1  ;;  %v870_v14 = vrot.slane %v483_v37, 2 }
  0xfe   : > { %v1001_v11 = vmul.f32 %v1718_v3, %v906_v43  ;;  %v1983_v55 = vadd.f32 %v760_v48, %v686_v63  ;;  %v2000_v43 = vadd.f32 %v615_v62, %v1615_v28  ;;  %v2573_v48 = vrot.slane %v1763_v31, 1 }
  0xff   : > { %v937_v40 = vadd.f32 %v1770_v44, %v847_v39  ;;  %2567 = vst [vmem:[#allocation33_spill] sm:$0xff] %v1972_v38  ;;  %v1980_v53 = vsel %vm717_vm2, %v2568_v21, %v2518_v13  ;;  %v2571_v44 = vrot.slane %v1908_v56, 2  ;;  %v2572_v39 = vrot.slane %v1809_v45, 2 }
 0x100   : > { %2569 = vst [vmem:[#allocation34_spill] sm:$0xff] %v1980_v53  ;;  %v1987_v0 = vmul.f32 %v1698_v61, %v1980_v53  ;;  %v1997_v21 = vadd.f32 %v1591_v19, %v569_v9  ;;  %v735_v37 = vsel %vm717_vm2, %v696_v30, %v2573_v48  ;;  %v2577_v9 = vrot.slane %v1763_v31, 2 }
 0x101   : > { %v894_v38 = vsel %vm889_vm3, %v2572_v39, %v2571_v44  ;;  %v978_v42 = vadd.f32 %v960_v12, %v937_v40  ;;  %v2576_v44 = vrot.slane %v1836_v49, 1  ;;  %v2021_v40 = vmul.f32 %v1660_v50, %v735_v37 }
 0x102   : > { %2570 = vst [vmem:[#allocation35_spill] sm:$0xff] %v1987_v0  ;;  %v2007_v63 = vmul.f32 %v1713_v2, %v894_v38  ;;  %v2010_v13 = vmul.f32 %v1718_v3, %v894_v38  ;;  %v907_v28 = vsel %vm889_vm3, %v870_v14, %v2577_v9  ;;  %v2578_v48 = vrot.slane %v1836_v49, 2 }
 0x103   : > { %v736_v12 = vsel %vm717_vm2, %v2576_v44, %v696_v30  ;;  %v1019_v62 = vadd.f32 %v1001_v11, %v978_v42  ;;  %v2039_v31 = vmul.f32 %v1686_v58, %v735_v37  ;;  %v2045_v30 = vmul.f32 %v1674_v54, %v907_v28 }
 0x104   : > { %2574 = vst [vmem:[#allocation36_spill] sm:$0xff] %v2007_v63  ;;  %2575 = vst [vmem:[#allocation37_spill] sm:$0xff] %v2010_v13  ;;  %v789_v39 = vmul.f32 %v1686_v58, %v736_v12  ;;  %v908_v38 = vsel %vm889_vm3, %v2578_v48, %v870_v14  ;;  %v2028_v13 = vpop.f32.mrf.mxu1  ;;  %v2030_v63 = vpop.f32.mrf.mxu0  ;;  %v751_v42 = vmul.f32 %v1660_v50, %v736_v12  ;;  %v2581_v53 = vrot.slane %v1809_v45, 2 }
 0x105   : > { %v2042_v49 = vmul.f32 %v1674_v54, %v908_v38  ;;  %2579 = vst [vmem:[#allocation38_spill] sm:$0xff] %v2045_v30  ;;  %v1322_v14 = vpack.c.bf16 %v1019_v62, %v1019_v62  ;;  %v2048_v44 = vmul.f32 %v1713_v2, %v908_v38  ;;  %v2051_v9 = vmul.f32 %v1713_v2, %v907_v28 }
 0x106   : > { %v807_v11 = vadd.f32 %v789_v39, %v766_v10  ;;  %v2055_v12 = vmul.f32 %v1579_v16, %v2028_v13  ;;  %v627_v37 = vmul.f32 %v1584_v17, %v2028_v13  ;;  %v882_v48 = vrot.slane %v2028_v13, 2  ;;  %v2073_v38 = vpop.f32.mrf.mxu1 }
 0x107   : > { %2580 = vst [vmem:[#allocation39_spill] sm:$0xff] %v2051_v9  ;;  %v574_v0 = vmul.f32 %v2030_v63, %v1579_v16  ;;  %1116 = vst.msk [vmem:[%s2035_s29] sm:$0xf] %vm1115_vm4, %v1322_v14  ;;  %v2066_v10 = vmul.f32 %v1596_v20, %v2028_v13  ;;  %v620_v62 = vmul.f32 %v2030_v63, %v1584_v17  ;;  %v2583_v14 = vrot.slane %v1854_v52, 2 }
 0x108   : > { %v659_v39 = vmul.f32 %v2030_v63, %v1596_v20  ;;  %v2079_v9 = vsel %vm889_vm3, %v882_v48, %v2581_v53  ;;  %v605_v22 = vadd.f32 %v1591_v19, %v1872_v23  ;;  %v2102_v23 = vpop.f32.mrf.mxu0  ;;  %v2592_v34 = vrot.slane %v1908_v56, 1 }
 0x109   : > { %2582 = vst [vmem:[#allocation40_spill] sm:$0xff] %v2079_v9  ;;  %v2085_v30 = vsel %vm889_vm3, %v2583_v14, %v882_v48  ;;  %v599_v28 = vadd.f32 %v1591_v19, %v574_v0  ;;  %v638_v18 = vadd.f32 %v620_v62, %v1925_v36  ;;  %v671_v0 = vmul.f32 %v2073_v38, %v1596_v20 }
 0x10a   : > { %2584 = vst [vmem:[#allocation41_spill] sm:$0xff] %v2085_v30  ;;  %v2092_v59 = vmul.f32 %v1713_v2, %v2085_v30  ;;  %v677_v48 = vadd.f32 %v659_v39, %v1927_v41  ;;  %v647_v14 = vadd.f32 %v1939_v51, %v605_v22  ;;  %2585 = vst [vmem:[#allocation42_spill] sm:$0xff] %v2102_v23  ;;  %v2589_v41 = vrot.slane %v1854_v52, 1  ;;  %v2129_v52 = vpop.f32.mrf.mxu1 }
 0x10b   : > { %v641_v27 = vadd.f32 %v1777_v24, %v599_v28  ;;  %v2106_v46 = vmul.f32 %v1718_v3, %v2085_v30  ;;  %v2110_v36 = vmul.f32 %v1718_v3, %v2079_v9  ;;  %v680_v62 = vadd.f32 %v1783_v4, %v638_v18 }
 0x10c   : > { %v2588_v24 = vrot.slane %v2028_v13, 1  ;;  %v689_v51 = vadd.f32 %v671_v0, %v647_v14  ;;  %v769_v9 = vadd.f32 %v751_v42, %v677_v48  ;;  %v572_v18 = vmul.f32 %v1579_v16, %v2102_v23 }
 0x10d   : > { %2586 = vst [vmem:[#allocation43_spill] sm:$0xff] %v2106_v46  ;;  %2587 = vst [vmem:[#allocation44_spill] sm:$0xff] %v2110_v36  ;;  %v2123_v53 = vadd.f32 %v1892_v7, %v641_v27  ;;  %v618_v4 = vmul.f32 %v1584_v17, %v2102_v23  ;;  %v657_v0 = vmul.f32 %v1596_v20, %v2102_v23  ;;  %v2590_v28 = vrot.slane %v1874_v25, 1 }
 0x10e   : > { %v724_v22 = vsel %vm717_vm2, %v2589_v41, %v2588_v24  ;;  %v2526_v24 = vrot.slane %v2102_v23, 1  ;;  %v2525_v41 = vrot.slane %v2102_v23, 2  ;;  %v597_v42 = vadd.f32 %v1591_v19, %v572_v18 }
 0x10f   : > { %v763_v39 = vmul.f32 %v1660_v50, %v724_v22  ;;  %v801_v14 = vmul.f32 %v1686_v58, %v724_v22  ;;  %v2139_v7 = vmul.f32 %v1698_v61, %v724_v22  ;;  %v636_v48 = vadd.f32 %v618_v4, %v1997_v21 }
 0x110   : > { %v675_v5 = vadd.f32 %v657_v0, %v2000_v43  ;;  %v733_v36 = vsel %vm717_vm2, %v2590_v28, %v2526_v24  ;;  %v645_v4 = vadd.f32 %v627_v37, %v1627_v33 }
 0x111   : > { %v2136_v27 = vadd.f32 %v763_v39, %v689_v51  ;;  %v2591_v51 = vrot.slane %v1874_v25, 2  ;;  %v669_v39 = vmul.f32 %v1596_v20, %v2129_v52  ;;  %v754_v21 = vmul.f32 %v1660_v50, %v733_v36 }
 0x112   : > { %v792_v43 = vmul.f32 %v1686_v58, %v733_v36  ;;  %v830_v18 = vmul.f32 %v1698_v61, %v733_v36  ;;  %v767_v28 = vadd.f32 %v1721_v6, %v675_v5  ;;  %v711_v36 = vrot.slane %v2129_v52, 1 }
 0x113   : > { %v905_v22 = vsel %vm889_vm3, %v2591_v51, %v2525_v41  ;;  %v2171_v51 = vmul.f32 %v1584_v17, %v2129_v52  ;;  %v1366_v41 = vpop.f32.mrf.mxu0  ;;  %v687_v30 = vadd.f32 %v669_v39, %v645_v4  ;;  %v772_v33 = vadd.f32 %v754_v21, %v680_v62 }
 0x114   : > { %v2164_v0 = vmul.f32 %v1674_v54, %v905_v22  ;;  %v2167_v25 = vmul.f32 %v1713_v2, %v905_v22  ;;  %v848_v24 = vadd.f32 %v830_v18, %v807_v11  ;;  %v1002_v23 = vmul.f32 %v1718_v3, %v905_v22 }
 0x115   : > { %v810_v37 = vadd.f32 %v792_v43, %v769_v9  ;;  %v761_v6 = vmul.f32 %v1660_v50, %v1708_v1  ;;  %v885_v5 = vrot.slane %v2129_v52, 2  ;;  %v721_v11 = vsel %vm717_vm2, %v2592_v34, %v711_v36  ;;  %v2649_v52 = vld [vmem:[#allocation18_spill] sm:$0xff] }
 0x116   : > { %v938_v46 = vadd.f32 %v1774_v47, %v848_v24  ;;  %v575_v22 = vmul.f32 %v1366_v41, %v1579_v16  ;;  %v621_v39 = vmul.f32 %v1366_v41, %v1584_v17  ;;  %v2188_v9 = vadd.f32 %v2039_v31, %v767_v28 }
 0x117   : > { %v819_v1 = vadd.f32 %v801_v14, %v1983_v55  ;;  %v842_v62 = vmul.f32 %v1698_v61, %v721_v11  ;;  %v2593_v47 = vrot.slane %v1908_v56, 2  ;;  %v2199_v21 = vadd.f32 %v761_v6, %v687_v30 }
 0x118   : > { %v979_v34 = vadd.f32 %v2048_v44, %v938_v46  ;;  %v804_v43 = vmul.f32 %v1686_v58, %v721_v11  ;;  %v600_v31 = vadd.f32 %v1591_v19, %v575_v22  ;;  %v660_v14 = vmul.f32 %v1366_v41, %v1596_v20 }
 0x119   : > { %v893_v24 = vsel %vm889_vm3, %v2593_v47, %v885_v5  ;;  %v860_v18 = vadd.f32 %v842_v62, %v819_v1  ;;  %v702_v4 = vrot.slane %v1366_v41, 1  ;;  %v639_v47 = vadd.f32 %v621_v39, %v597_v42 }
 0x11a   : > { %v2204_v55 = vmul.f32 %v1713_v2, %v893_v24  ;;  %v1020_v28 = vadd.f32 %v1002_v23, %v979_v34  ;;  %v1014_v56 = vmul.f32 %v1718_v3, %v893_v24  ;;  %v642_v46 = vadd.f32 %v1610_v26, %v600_v31 }
 0x11b   : > { %v950_v30 = vadd.f32 %v1834_v35, %v860_v18  ;;  %v678_v44 = vadd.f32 %v660_v14, %v636_v48  ;;  %v2594_v6 = vrot.slane %v1624_v32, 1  ;;  %v876_v22 = vrot.slane %v1366_v41, 2 }
 0x11c   : > { %v1323_v1 = vpack.c.bf16 %v1020_v28, %v1020_v28  ;;  %v684_v62 = vadd.f32 %v2066_v10, %v642_v46  ;;  %v2595_v23 = vrot.slane %v2030_v63, 1  ;;  %v606_v39 = vadd.f32 %v1591_v19, %v2055_v12 }
 0x11d   : > { %v729_v11 = vsel %vm717_vm2, %v702_v4, %v2594_v6  ;;  %v991_v26 = vadd.f32 %v2092_v59, %v950_v30  ;;  %v2228_v10 = vadd.f32 %v1619_v29, %v639_v47  ;;  %v2231_v41 = vadd.f32 %v2021_v40, %v678_v44 }
 0x11e   : > { %v730_v24 = vsel %vm717_vm2, %v2595_v23, %v702_v4  ;;  %v758_v42 = vmul.f32 %v1660_v50, %v729_v11  ;;  %1117 = vst.msk [vmem:[%s2035_s29 + $0x4] sm:$0xf] %vm1115_vm4, %v1323_v1  ;;  %v2596_v4 = vrot.slane %v1624_v32, 2  ;;  %v2240_v28 = vmul.f32 %v1686_v58, %v729_v11 }
 0x11f   : > { %v757_v35 = vmul.f32 %v1660_v50, %v730_v24  ;;  %v795_v48 = vmul.f32 %v1686_v58, %v730_v24  ;;  %v833_v31 = vmul.f32 %v1698_v61, %v730_v24  ;;  %v1032_v18 = vadd.f32 %v1014_v56, %v991_v26 }
 0x120   : > { %v776_v34 = vadd.f32 %v758_v42, %v684_v62  ;;  %v901_v12 = vsel %vm889_vm3, %v876_v22, %v2596_v4  ;;  %v2243_v29 = vmul.f32 %v1698_v61, %v729_v11  ;;  %v2597_v47 = vrot.slane %v2030_v63, 2 }
 0x121   : > { %v775_v59 = vadd.f32 %v757_v35, %v2123_v53  ;;  %v813_v14 = vadd.f32 %v795_v48, %v772_v33  ;;  %v851_v40 = vadd.f32 %v833_v31, %v810_v37  ;;  %v2249_v53 = vpop.f32.mrf.mxu1  ;;  %v1335_v33 = vpack.c.bf16 %v1032_v18, %v1032_v18  ;;  %v2601_v31 = vld [vmem:[#allocation20_spill] sm:$0xff] }
 0x122   : > { %v902_v56 = vsel %vm889_vm3, %v2597_v47, %v876_v22  ;;  %v930_v30 = vmul.f32 %v1674_v54, %v901_v12  ;;  %v2258_v11 = vmul.f32 %v1713_v2, %v901_v12  ;;  %v714_v23 = vrot.slane %v2249_v53, 1 }
 0x123   : > { %v816_v32 = vadd.f32 %v1816_v57, %v775_v59  ;;  %v854_v46 = vadd.f32 %v1828_v60, %v813_v14  ;;  %v929_v44 = vmul.f32 %v1674_v54, %v902_v56  ;;  %v941_v6 = vadd.f32 %v2042_v49, %v851_v40  ;;  %1129 = vst.msk [vmem:[%s2035_s29 + $0x34] sm:$0xf] %vm1115_vm4, %v1335_v33  ;;  %v2602_v59 = vld [vmem:[#allocation22_spill] sm:$0xff]  ;;  %v2605_v33 = vld [vmem:[#allocation43_spill] sm:$0xff] }
 0x124   : > { %v967_v37 = vmul.f32 %v1713_v2, %v902_v56  ;;  %v648_v57 = vadd.f32 %v2171_v51, %v606_v39  ;;  %v672_v60 = vmul.f32 %v2249_v53, %v1596_v20  ;;  %v1005_v49 = vmul.f32 %v1718_v3, %v902_v56  ;;  %v2603_v40 = vld [vmem:[#allocation2_spill] sm:$0xff] }
 0x125   : > { %v857_v22 = vadd.f32 %v2139_v7, %v816_v32  ;;  %v944_v1 = vadd.f32 %v2164_v0, %v854_v46  ;;  %v982_v62 = vadd.f32 %v2167_v25, %v941_v6  ;;  %v2598_v24 = vrot.slane %v1809_v45, 1 }
 0x126   : > { %v2599_v42 = vrot.slane %v2028_v13, 1  ;;  %v690_v51 = vadd.f32 %v672_v60, %v648_v57  ;;  %v817_v35 = vadd.f32 %v1728_v8, %v776_v34  ;;  %v2280_v48 = vmul.f32 %v1718_v3, %v901_v12  ;;  %v2293_v34 = vpop.f32.mrf.mxu0  ;;  %v2607_v57 = vld [vmem:[#allocation41_spill] sm:$0xff] }
 0x127   : > { %v947_v0 = vadd.f32 %v929_v44, %v857_v22  ;;  %v985_v26 = vadd.f32 %v967_v37, %v944_v1  ;;  %v1023_v25 = vadd.f32 %v1005_v49, %v982_v62  ;;  %v2600_v39 = vrot.slane %v2073_v38, 1 }
 0x128   : > { %v2276_v7 = vsel %vm717_vm2, %v2599_v42, %v2598_v24  ;;  %v822_v13 = vadd.f32 %v804_v43, %v2136_v27  ;;  %v2604_v47 = vrot.slane %v2603_v40, 1  ;;  %v888_v43 = vrot.slane %v2249_v53, 2 }
 0x129   : > { %v718_v45 = vsel %vm717_vm2, %v2600_v39, %v714_v23  ;;  %v988_v18 = vadd.f32 %v2601_v31, %v947_v0  ;;  %v1026_v14 = vadd.f32 %v2602_v59, %v985_v26  ;;  %v764_v4 = vmul.f32 %v1660_v50, %v2276_v7  ;;  %v2608_v0 = vld [vmem:[#allocation14_spill] sm:$0xff]  ;;  %v2610_v39 = vld [vmem:[#allocation8_spill] sm:$0xff] }
 0x12a   : > { %v840_v8 = vmul.f32 %v1698_v61, %v2276_v7  ;;  %v1326_v12 = vpack.c.bf16 %v1023_v25, %v1023_v25  ;;  %v741_v56 = vsel %vm717_vm2, %v714_v23, %v2604_v47  ;;  %v845_v27 = vmul.f32 %v1698_v61, %v718_v45  ;;  %v2611_v45 = vld [vmem:[#allocation16_spill] sm:$0xff] }
 0x12b   : > { %v1029_v32 = vadd.f32 %v2605_v33, %v988_v18  ;;  %v1329_v46 = vpack.c.bf16 %v1026_v14, %v1026_v14  ;;  %v2302_v44 = vadd.f32 %v764_v4, %v690_v51  ;;  %v2606_v22 = vrot.slane %v2073_v38, 2  ;;  %v2612_v14 = vld [vmem:[#allocation3_spill] sm:$0xff] }
 0x12c   : > { %v858_v6 = vadd.f32 %v840_v8, %v817_v35  ;;  %1120 = vst.msk [vmem:[%s2035_s29 + $0x10] sm:$0xf] %vm1115_vm4, %v1326_v12  ;;  %v863_v37 = vadd.f32 %v845_v27, %v822_v13  ;;  %v935_v60 = vmul.f32 %v1674_v54, %v2607_v57  ;;  %v573_v53 = vmul.f32 %v1579_v16, %v2293_v34  ;;  %v2609_v16 = vld [vmem:[#allocation12_spill] sm:$0xff]  ;;  %v2613_v8 = vld [vmem:[#allocation29_spill] sm:$0xff] }
 0x12d   : > { %v890_v1 = vsel %vm889_vm3, %v2606_v22, %v888_v43  ;;  %v1332_v62 = vpack.c.bf16 %v1029_v32, %v1029_v32  ;;  %1123 = vst.msk [vmem:[%s2035_s29 + $0x1c] sm:$0xf] %vm1115_vm4, %v1329_v46  ;;  %v2317_v49 = vmul.f32 %v1698_v61, %v741_v56  ;;  %v595_v26 = vadd.f32 %v1591_v19, %v2608_v0  ;;  %v2614_v12 = vld [vmem:[#allocation44_spill] sm:$0xff]  ;;  %v2616_v32 = vld [vmem:[#allocation42_spill] sm:$0xff] }
 0x12e   : > { %v948_v23 = vadd.f32 %v930_v30, %v858_v6  ;;  %v1017_v24 = vmul.f32 %v1718_v3, %v890_v1  ;;  %v953_v42 = vadd.f32 %v935_v60, %v863_v37  ;;  %v598_v51 = vadd.f32 %v1591_v19, %v573_v53  ;;  %v2618_v37 = vld [vmem:[#allocation4_spill] sm:$0xff]  ;;  %v2619_v1 = vld [vmem:[#allocation7_spill] sm:$0xff] }
 0x12f   : > { %v619_v35 = vmul.f32 %v1584_v17, %v2293_v34  ;;  %1126 = vst.msk [vmem:[%s2035_s29 + $0x28] sm:$0xf] %vm1115_vm4, %v1332_v62  ;;  %v634_v13 = vadd.f32 %v2611_v45, %v2610_v39  ;;  %v658_v30 = vmul.f32 %v1596_v20, %v2293_v34  ;;  %v700_v31 = vrot.slane %v2293_v34, 1 }
 0x130   : > { %v989_v25 = vadd.f32 %v2609_v16, %v948_v23  ;;  %v994_v18 = vadd.f32 %v2204_v55, %v953_v42  ;;  %v640_v4 = vadd.f32 %v2612_v14, %v598_v51  ;;  %v753_v17 = vmul.f32 %v1660_v50, %v2613_v8  ;;  %v2620_v23 = vld [vmem:[#allocation26_spill] sm:$0xff] }
 0x131   : > { %v637_v59 = vadd.f32 %v619_v35, %v595_v26  ;;  %v676_v56 = vadd.f32 %v658_v30, %v634_v13  ;;  %v2615_v27 = vrot.slane %v2030_v63, 1  ;;  %v2617_v46 = vrot.slane %v2616_v32, 1 }
 0x132   : > { %v1030_v47 = vadd.f32 %v2614_v12, %v989_v25  ;;  %v1035_v6 = vadd.f32 %v1017_v24, %v994_v18  ;;  %v682_v57 = vadd.f32 %v2619_v1, %v640_v4  ;;  %v791_v0 = vmul.f32 %v1686_v58, %v2613_v8  ;;  %v2622_v4 = vld [vmem:[#allocation15_spill] sm:$0xff] }
 0x133   : > { %v731_v33 = vsel %vm717_vm2, %v700_v31, %v2615_v27  ;;  %v732_v55 = vsel %vm717_vm2, %v2617_v46, %v700_v31  ;;  %v679_v22 = vadd.f32 %v2618_v37, %v637_v59  ;;  %v768_v42 = vadd.f32 %v2620_v23, %v676_v56  ;;  %v2627_v46 = vld [vmem:[#allocation9_spill] sm:$0xff]  ;;  %v2629_v37 = vld [vmem:[#allocation27_spill] sm:$0xff] }
 0x134   : > { %v755_v60 = vmul.f32 %v1660_v50, %v732_v55  ;;  %v1333_v53 = vpack.c.bf16 %v1030_v47, %v1030_v47  ;;  %v756_v62 = vmul.f32 %v1660_v50, %v731_v33  ;;  %v1338_v26 = vpack.c.bf16 %v1035_v6, %v1035_v6  ;;  %v2623_v47 = vld [vmem:[#allocation11_spill] sm:$0xff] }
 0x135   : > { %v771_v51 = vadd.f32 %v753_v17, %v679_v22  ;;  %v793_v24 = vmul.f32 %v1686_v58, %v732_v55  ;;  %v794_v25 = vmul.f32 %v1686_v58, %v731_v33  ;;  %v809_v39 = vadd.f32 %v791_v0, %v768_v42  ;;  %v2632_v23 = vld [vmem:[#allocation39_spill] sm:$0xff] }
 0x136   : > { %v773_v35 = vadd.f32 %v755_v60, %v2228_v10  ;;  %1127 = vst.msk [vmem:[%s2035_s29 + $0x2c] sm:$0xf] %vm1115_vm4, %v1333_v53  ;;  %v774_v16 = vadd.f32 %v756_v62, %v682_v57  ;;  %v831_v45 = vmul.f32 %v1698_v61, %v732_v55  ;;  %1132 = vst.msk [vmem:[%s2035_s29 + $0x40] sm:$0xf] %vm1115_vm4, %v1338_v26  ;;  %v874_v10 = vrot.slane %v2293_v34, 2  ;;  %v547_v60 = vpop.f32.mrf.mxu1  ;;  %v2631_v53 = vld [vmem:[#allocation32_spill] sm:$0xff] }
 0x137   : > { %v811_v13 = vadd.f32 %v793_v24, %v2231_v41  ;;  %v832_v31 = vmul.f32 %v1698_v61, %v731_v33  ;;  %v2621_v18 = vrot.slane %v2603_v40, 2  ;;  %v812_v14 = vadd.f32 %v794_v25, %v771_v51  ;;  %v2625_v40 = vld [vmem:[#allocation17_spill] sm:$0xff] }
 0x138   : > { %v814_v30 = vadd.f32 %v2240_v28, %v773_v35  ;;  %v815_v8 = vadd.f32 %v2622_v4, %v774_v16  ;;  %v849_v17 = vadd.f32 %v831_v45, %v2188_v9  ;;  %v2624_v56 = vrot.slane %v2030_v63, 2  ;;  %v2628_v9 = vld [vmem:[#allocation6_spill] sm:$0xff]  ;;  %v2633_v51 = vld [vmem:[#allocation33_spill] sm:$0xff] }
 0x139   : > { %v2369_v59 = vsel %vm889_vm3, %v888_v43, %v2621_v18  ;;  %v850_v12 = vadd.f32 %v832_v31, %v809_v39  ;;  %v852_v41 = vadd.f32 %v2243_v29, %v811_v13  ;;  %v853_v27 = vadd.f32 %v2625_v40, %v812_v14  ;;  %v2630_v63 = vld [vmem:[#allocation38_spill] sm:$0xff]  ;;  %v2634_v39 = vld [vmem:[#allocation24_spill] sm:$0xff]  ;;  %v2635_v14 = vld [vmem:[#allocation21_spill] sm:$0xff] }
 0x13a   : > { %v855_v28 = vadd.f32 %v2623_v47, %v814_v30  ;;  %v903_v34 = vsel %vm889_vm3, %v874_v10, %v2624_v56  ;;  %v2626_v43 = vrot.slane %v2616_v32, 2  ;;  %v939_v55 = vadd.f32 %v2627_v46, %v849_v17 }
 0x13b   : > { %v604_v6 = vadd.f32 %v1591_v19, %v2628_v9  ;;  %v940_v22 = vadd.f32 %v2629_v37, %v850_v12  ;;  %v942_v1 = vadd.f32 %v2630_v63, %v852_v41  ;;  %v943_v62 = vadd.f32 %v2631_v53, %v853_v27  ;;  %v2636_v41 = vld [vmem:[#allocation23_spill] sm:$0xff] }
 0x13c   : > { %v904_v33 = vsel %vm889_vm3, %v2626_v43, %v874_v10  ;;  %v966_v32 = vmul.f32 %v1713_v2, %v903_v34  ;;  %v980_v42 = vadd.f32 %v2632_v23, %v939_v55  ;;  %v1004_v24 = vmul.f32 %v1718_v3, %v903_v34 }
 0x13d   : > { %v927_v29 = vmul.f32 %v1674_v54, %v904_v33  ;;  %v965_v57 = vmul.f32 %v1713_v2, %v904_v33  ;;  %v1003_v0 = vmul.f32 %v1718_v3, %v904_v33  ;;  %v981_v19 = vadd.f32 %v2633_v51, %v940_v22  ;;  %v2642_v22 = vld [vmem:[#allocation34_spill] sm:$0xff]  ;;  %v2644_v51 = vld [vmem:[#allocation35_spill] sm:$0xff] }
 0x13e   : > { %v984_v16 = vadd.f32 %v966_v32, %v943_v62  ;;  %v646_v45 = vadd.f32 %v2634_v39, %v604_v6  ;;  %v670_v13 = vmul.f32 %v1596_v20, %v547_v60  ;;  %v712_v18 = vrot.slane %v547_v60, 1  ;;  %v2640_v20 = vld [vmem:[#allocation13_spill] sm:$0xff]  ;;  %v2647_v39 = vld [vmem:[#allocation40_spill] sm:$0xff] }
 0x13f   : > { %v945_v26 = vadd.f32 %v927_v29, %v855_v28  ;;  %v983_v35 = vadd.f32 %v965_v57, %v942_v1  ;;  %v1021_v25 = vadd.f32 %v1003_v0, %v980_v42  ;;  %v1022_v31 = vadd.f32 %v1004_v24, %v981_v19  ;;  %v2638_v28 = vld [vmem:[#allocation5_spill] sm:$0xff] }
 0x140   : > { %v1025_v4 = vadd.f32 %v2635_v14, %v984_v16  ;;  %v688_v12 = vadd.f32 %v670_v13, %v646_v45  ;;  %v2637_v47 = vrot.slane %v2636_v41, 1  ;;  %v2639_v56 = vrot.slane %v2638_v28, 1  ;;  %v2643_v57 = vld [vmem:[#allocation25_spill] sm:$0xff]  ;;  %v2645_v16 = vld [vmem:[#allocation10_spill] sm:$0xff]  ;;  %v2650_v14 = vld [vmem:[#allocation19_spill] sm:$0xff] }
 0x141   : > { %v986_v30 = vadd.f32 %v2258_v11, %v945_v26  ;;  %v1024_v10 = vadd.f32 %v2280_v48, %v983_v35  ;;  %v1324_v17 = vpack.c.bf16 %v1021_v25, %v1021_v25  ;;  %v1325_v27 = vpack.c.bf16 %v1022_v31, %v1022_v31  ;;  %v2652_v41 = vld [vmem:[#allocation36_spill] sm:$0xff] }
 0x142   : > { %v725_v40 = vsel %vm717_vm2, %v2639_v56, %v2637_v47  ;;  %v2641_v48 = vrot.slane %v2073_v38, 1  ;;  %v1328_v46 = vpack.c.bf16 %v1025_v4, %v1025_v4  ;;  %v720_v55 = vsel %vm717_vm2, %v711_v36, %v712_v18  ;;  %v2653_v56 = vld [vmem:[#allocation31_spill] sm:$0xff] }
 0x143   : > { %v1027_v11 = vadd.f32 %v2640_v20, %v986_v30  ;;  %v1327_v43 = vpack.c.bf16 %v1024_v10, %v1024_v10  ;;  %1118 = vst.msk [vmem:[%s2035_s29 + $0x8] sm:$0xf] %vm1115_vm4, %v1324_v17  ;;  %v762_v9 = vmul.f32 %v1660_v50, %v725_v40  ;;  %v800_v6 = vmul.f32 %v1686_v58, %v725_v40  ;;  %v2651_v17 = vld [vmem:[#allocation30_spill] sm:$0xff]  ;;  %v2654_v20 = vld [vmem:[#allocation37_spill] sm:$0xff] }
 0x144   : > { %v719_v33 = vsel %vm717_vm2, %v712_v18, %v2641_v48  ;;  %1119 = vst.msk [vmem:[%s2035_s29 + $0xc] sm:$0xf] %vm1115_vm4, %v1325_v27  ;;  %v802_v37 = vmul.f32 %v1686_v58, %v2276_v7  ;;  %v803_v63 = vmul.f32 %v1686_v58, %v2642_v22  ;;  %v805_v1 = vmul.f32 %v1686_v58, %v720_v55 }
 0x145   : > { %v1330_v29 = vpack.c.bf16 %v1027_v11, %v1027_v11  ;;  %1121 = vst.msk [vmem:[%s2035_s29 + $0x14] sm:$0xf] %vm1115_vm4, %v1327_v43  ;;  %1122 = vst.msk [vmem:[%s2035_s29 + $0x18] sm:$0xf] %vm1115_vm4, %v1328_v46  ;;  %v780_v36 = vadd.f32 %v762_v9, %v688_v12  ;;  %v818_v50 = vadd.f32 %v800_v6, %v2643_v57  ;;  %v886_v42 = vrot.slane %v547_v60, 2 }
 0x146   : > { %v838_v53 = vmul.f32 %v1698_v61, %v725_v40  ;;  %v843_v62 = vmul.f32 %v1698_v61, %v720_v55  ;;  %v928_v32 = vmul.f32 %v1674_v54, %v903_v34  ;;  %v820_v7 = vadd.f32 %v802_v37, %v2199_v21 }
 0x147   : > { %1124 = vst.msk [vmem:[%s2035_s29 + $0x20] sm:$0xf] %vm1115_vm4, %v1330_v29  ;;  %v823_v23 = vadd.f32 %v805_v1, %v2302_v44  ;;  %v821_v0 = vadd.f32 %v803_v63, %v780_v36  ;;  %v844_v58 = vmul.f32 %v1698_v61, %v719_v33  ;;  %v859_v19 = vadd.f32 %v2644_v51, %v818_v50  ;;  %v2646_v44 = vld [vmem:[#allocation28_spill] sm:$0xff] }
 0x148   : > { %v856_v26 = vadd.f32 %v838_v53, %v815_v8  ;;  %v861_v35 = vadd.f32 %v843_v62, %v820_v7  ;;  %v892_v34 = vsel %vm889_vm3, %v885_v5, %v886_v42  ;;  %v933_v21 = vmul.f32 %v1674_v54, %v2645_v16 }
 0x149   : > { %v864_v24 = vadd.f32 %v2317_v49, %v823_v23  ;;  %v862_v25 = vadd.f32 %v844_v58, %v821_v0  ;;  %v934_v60 = vmul.f32 %v1674_v54, %v2646_v44  ;;  %v936_v61 = vmul.f32 %v1674_v54, %v2647_v39 }
 0x14a   : > { %v946_v8 = vadd.f32 %v928_v32, %v856_v26  ;;  %v2648_v45 = vrot.slane %v2073_v38, 2  ;;  %v949_v13 = vadd.f32 %v2649_v52, %v859_v19  ;;  %v951_v30 = vadd.f32 %v933_v21, %v861_v35 }
 0x14b   : > { %v974_v5 = vmul.f32 %v1713_v2, %v2647_v39  ;;  %v952_v31 = vadd.f32 %v934_v60, %v862_v25  ;;  %v954_v10 = vadd.f32 %v936_v61, %v864_v24  ;;  %v977_v18 = vmul.f32 %v1713_v2, %v892_v34 }
 0x14c   : > { %v891_v49 = vsel %vm889_vm3, %v886_v42, %v2648_v45  ;;  %v987_v4 = vadd.f32 %v2650_v14, %v946_v8  ;;  %v1018_v54 = vmul.f32 %v1718_v3, %v2369_v59  ;;  %v990_v38 = vadd.f32 %v2651_v17, %v949_v13 }
 0x14d   : > { %v992_v15 = vadd.f32 %v974_v5, %v951_v30  ;;  %v1015_v12 = vmul.f32 %v1718_v3, %v892_v34  ;;  %v993_v47 = vadd.f32 %v2652_v41, %v952_v31  ;;  %v995_v28 = vadd.f32 %v977_v18, %v954_v10 }
 0x14e   : > { %v1016_v2 = vmul.f32 %v1718_v3, %v891_v49  ;;  %v1028_v40 = vadd.f32 %v2653_v56, %v987_v4  ;;  %v1031_v11 = vadd.f32 %v2654_v20, %v990_v38 }
 0x14f   : > { %v1033_v59 = vadd.f32 %v1015_v12, %v992_v15  ;;  %v1036_v43 = vadd.f32 %v1018_v54, %v995_v28 }
 0x150   : > { %v1034_v27 = vadd.f32 %v1016_v2, %v993_v47  ;;  %v1331_v48 = vpack.c.bf16 %v1028_v40, %v1028_v40  ;;  %v1334_v33 = vpack.c.bf16 %v1031_v11, %v1031_v11 }
 0x151   : > { %v1336_v46 = vpack.c.bf16 %v1033_v59, %v1033_v59  ;;  %v1339_v9 = vpack.c.bf16 %v1036_v43, %v1036_v43 }
 0x152   : > { %v1337_v55 = vpack.c.bf16 %v1034_v27, %v1034_v27  ;;  %1125 = vst.msk [vmem:[%s2035_s29 + $0x24] sm:$0xf] %vm1115_vm4, %v1331_v48  ;;  %1128 = vst.msk [vmem:[%s2035_s29 + $0x30] sm:$0xf] %vm1115_vm4, %v1334_v33 }
 0x153   : > { %1130 = vst.msk [vmem:[%s2035_s29 + $0x38] sm:$0xf] %vm1115_vm4, %v1336_v46  ;;  %1133 = vst.msk [vmem:[%s2035_s29 + $0x44] sm:$0xf] %vm1115_vm4, %v1339_v9 }
 0x154   : > { %1131 = vst.msk [vmem:[%s2035_s29 + $0x3c] sm:$0xf] %vm1115_vm4, %v1337_v55 }
 0x155 PF: > { %s15_s22 = sadd.s32 1, %s1479_s22   ;;  %s2655_s18 = smov %s1471_s20 }
 0x156   : > { %p12_p9 = scmp.ge.s32.totalorder %s15_s22, 8   ;;  %s2656_s19 = smov %s1475_s21 }
 0x157   : > { %s2657_s20 = smov %s2660_s23  ;;  %s2658_s21 = smov %s2664_s24 }
 0x158   :  { %14 = sbr.rel (!%p12_p9) target bundleno = 3 (0x3), region = 75 }

</bundles_post_ra>
